<compile_context>
chip_gen: v7x
topology: tpu7x:2x2x1
jax: 0.10.0
libtpu: 0.0.40
codegen_flags: <defaults>
</compile_context>

<pallas_src>
import jax
import jax.numpy as jnp
import numpy as np
from jax.experimental import pallas as pl
from jax.experimental.pallas import tpu as pltpu


def _round_up(x, m):
    return ((x + m - 1) // m) * m


def _vmem_params():
    """(per-block-set byte budget, vmem_limit_bytes) sized per TPU generation."""
    try:
        cap = int(pltpu.get_tpu_info().vmem_capacity_bytes)
    except Exception:  # query unavailable (e.g. interpret mode) -> be conservative
        cap = 64 << 20
    if cap >= (96 << 20):        # v5e / v6e: 128 MiB physical VMEM
        return 16 << 20, 64 << 20
    return 8 << 20, 48 << 20     # v7x: 64 MiB per TensorCore


def _largest_aligned_divisor(n, cap, align=8):
    """Largest divisor of n that is <= cap and a multiple of `align`, else None."""
    cap = max(1, min(n, int(cap)))
    for d in range(cap, align - 1, -1):
        if n % d == 0 and d % align == 0:
            return d
    return None


def _pick_m_tile(m, cin_p, cout_p, in_isz, out_isz, budget_bytes, min_steps=8):
    """Rows (output pixels) per grid step.

    The budget covers the Pallas double-buffered input/output blocks plus the
    (also double-buffered) weight/shift blocks.  The tile is additionally
    capped so the grid keeps >= min_steps steps: v7x shards the parallel axis
    across its 2 TensorCores and every generation needs a step i+1 to
    prefetch, so a 1-step grid both idles a core and exposes the DMA latency.
    """
    weight_bytes = 2 * (cin_p * cout_p * in_isz + cout_p * 4)
    row_bytes = 2 * (4 * cin_p * in_isz + cout_p * out_isz)
    cap = max(8, (budget_bytes - weight_bytes) // row_bytes)
    if m >= 8 * min_steps:
        cap = min(cap, m // min_steps)
    mt = _largest_aligned_divisor(m, cap)
    if mt is None:
        # No sublane-aligned (x8) divisor <= cap: fall back to the full extent
        # (block dim == array dim is always legal).  Only hit for tiny/odd M.
        mt = m
    return mt


def _pick_sub_rows(mt, target=256):
    """In-kernel M sub-tile: bounds live f32 intermediates to ~target rows."""
    if mt <= target:
        return mt
    d = _largest_aligned_divisor(mt, target)
    return d if d is not None else mt


def _make_transition_kernel(sub_rows):
    def kernel(x_ref, w_ref, shift_ref, o_ref):
        # x_ref:     (4, Mt, Cin_p)   -- leading axis = 2x2 pooling offset
        # w_ref:     (Cin_p, Cout_p)  -- 1x1 conv weight, BN scale * 0.25 folded in
        # shift_ref: (1, Cout_p) f32  -- folded BN shift * 0.25
        # o_ref:     (Mt, Cout_p)     -- compute dtype (bf16 in production)
        _, mt, _ = x_ref.shape
        w = w_ref[...]
        shift = shift_ref[...]
        nsub = mt // sub_rows

        def compute_chunk(r0, rows):
            # 4 offset matmuls share one resident RHS; f32 MXU accumulation.
            def one(k):
                y = jnp.dot(x_ref[k, pl.ds(r0, rows), :], w,
                            preferred_element_type=jnp.float32)
                return jnp.maximum(y + shift, 0.0)

            # AvgPool2d(2) == sum of the four pre-scaled, ReLU'd offset streams.
            acc = one(0) + one(1) + one(2) + one(3)
            o_ref[pl.ds(r0, rows), :] = acc.astype(o_ref.dtype)

        if nsub == 1:
            compute_chunk(0, mt)
        else:
            def body(i, carry):
                compute_chunk(pl.multiple_of(i * sub_rows, sub_rows), sub_rows)
                return carry

            jax.lax.fori_loop(0, nsub, body, 0, unroll=nsub <= 8)

    return kernel


def _fold_bn_into_conv(conv_w, gamma, beta, mean, var, eps, cin_p, cout_p,
                       compute_dtype):
    """Fold eval-mode BN *and* the 1/4 AvgPool factor into weight + shift."""
    cout, cin = conv_w.shape[0], conv_w.shape[1]
    scale = gamma.astype(jnp.float32) / jnp.sqrt(var.astype(jnp.float32) + eps)
    w = conv_w.reshape(cout, cin).astype(jnp.float32)
    w = (w * scale[:, None]).T * 0.25                       # (Cin, Cout)
    shift = (beta.astype(jnp.float32) - mean.astype(jnp.float32) * scale) * 0.25
    if cin_p != cin:
        w = jnp.pad(w, ((0, cin_p - cin), (0, 0)))
    if cout_p != cout:
        w = jnp.pad(w, ((0, 0), (0, cout_p - cout)))
        shift = jnp.pad(shift, (0, cout_p - cout))
    return w.astype(compute_dtype), shift.reshape(1, cout_p).astype(jnp.float32)


def _transition_pallas(x_off, w, shift, n, ho, wo, cout, compute_dtype):
    """x_off: (2, 2, N, Ho, Wo, Cin_p) offset-major, compute dtype.

    Returns NHWC output (N, Ho, Wo, Cout) in compute dtype.
    """
    cin_p = x_off.shape[-1]
    cout_p = w.shape[1]
    m = n * ho * wo
    x = x_off.reshape(4, m, cin_p)            # contiguous collapse: free

    budget, vmem_limit = _vmem_params()
    in_isz = jnp.dtype(compute_dtype).itemsize
    out_isz = jnp.dtype(compute_dtype).itemsize
    mt = _pick_m_tile(m, cin_p, cout_p, in_isz, out_isz, budget)
    sub = _pick_sub_rows(mt)

    out = pl.pallas_call(
        _make_transition_kernel(sub),
        out_shape=jax.ShapeDtypeStruct((m, cout_p), compute_dtype),
        grid_spec=pltpu.PrefetchScalarGridSpec(
            num_scalar_prefetch=0,
            grid=(m // mt,),
            in_specs=[
                pl.BlockSpec((4, mt, cin_p), lambda i: (0, i, 0)),
                pl.BlockSpec((cin_p, cout_p), lambda i: (0, 0)),
                pl.BlockSpec((1, cout_p), lambda i: (0, 0)),
            ],
            out_specs=pl.BlockSpec((mt, cout_p), lambda i: (i, 0)),
        ),
        compiler_params=pltpu.CompilerParams(
            dimension_semantics=("parallel",),
            vmem_limit_bytes=vmem_limit,
        ),
    )(x, w, shift)

    out = out.reshape(n, ho, wo, cout_p)
    if cout_p != cout:
        out = out[..., :cout]
    return out


def transition_forward_nhwc(x_nhwc, conv_w, bn_gamma, bn_beta, bn_mean, bn_var,
                            eps=1e-5, compute_dtype=jnp.bfloat16):
    """Channels-last entry point (preferred in production).

    Consumes NHWC, produces NHWC in `compute_dtype` — no NCHW<->NHWC layout
    passes around the memory-bound kernel.
    """
    n, h, w_, cin = x_nhwc.shape
    cout = conv_w.shape[0]
    assert h % 2 == 0 and w_ % 2 == 0
    ho, wo = h // 2, w_ // 2
    cin_p, cout_p = _round_up(cin, 128), _round_up(cout, 128)

    wgt, shift = _fold_bn_into_conv(conv_w, bn_gamma, bn_beta, bn_mean, bn_var,
                                    eps, cin_p, cout_p, compute_dtype)

    # Single layout pass: NHWC -> (2x2 offset, N, Ho, Wo, Cin).  The transpose,
    # guarded channel pad and bf16 cast all feed one XLA copy fusion, so the
    # activation makes exactly one HBM round trip here.
    # TODO(synk): in a fully fused DenseNet block this pass belongs in the
    # producer kernel; feed _transition_pallas the offset-major slab directly.
    x = x_nhwc.reshape(n, ho, 2, wo, 2, cin)
    x = jnp.transpose(x, (2, 4, 0, 1, 3, 5))          # (2, 2, N, Ho, Wo, Cin)
    if cin_p != cin:
        x = jnp.pad(x, ((0, 0),) * 5 + ((0, cin_p - cin),))
    x = x.astype(compute_dtype)

    return _transition_pallas(x, wgt, shift, n, ho, wo, cout, compute_dtype)


def transition_forward(x_nchw, conv_w, bn_gamma, bn_beta, bn_mean, bn_var,
                       eps=1e-5, compute_dtype=jnp.bfloat16):
    """PyTorch-layout wrapper (NCHW in, NCHW out) kept for parity/checking.

    Production code should prefer `transition_forward_nhwc`: the NCHW-facing
    transposes here are pure HBM-layout cost around a memory-bound kernel.
    x_nchw: (N, Cin, H, W); conv_w: (Cout, Cin, 1, 1) (PyTorch layouts).
    """
    n, cin, h, w_ = x_nchw.shape
    cout = conv_w.shape[0]
    assert h % 2 == 0 and w_ % 2 == 0
    ho, wo = h // 2, w_ // 2
    cin_p, cout_p = _round_up(cin, 128), _round_up(cout, 128)

    wgt, shift = _fold_bn_into_conv(conv_w, bn_gamma, bn_beta, bn_mean, bn_var,
                                    eps, cin_p, cout_p, compute_dtype)

    # One fused layout pass: the NCHW->channels-last move and the 2x2 pooling
    # rearrangement share a single transpose (+ guarded pad + cast).
    x = x_nchw.reshape(n, cin, ho, 2, wo, 2)
    x = jnp.transpose(x, (3, 5, 0, 2, 4, 1))           # (2, 2, N, Ho, Wo, Cin)
    if cin_p != cin:
        x = jnp.pad(x, ((0, 0),) * 5 + ((0, cin_p - cin),))
    x = x.astype(compute_dtype)

    out = _transition_pallas(x, wgt, shift, n, ho, wo, cout, compute_dtype)
    # NHWC -> NCHW epilogue only for PyTorch parity (crop happened first, so
    # this moves the minimum number of bytes).
    return jnp.transpose(out, (0, 3, 1, 2))


def _reference(x_nchw, conv_w, bn_gamma, bn_beta, bn_mean, bn_var, eps=1e-5):
    """Plain-JAX f32 reference of the PyTorch forward pass (NCHW)."""
    N, Cin, H, W = x_nchw.shape
    Cout = conv_w.shape[0]
    w = conv_w.reshape(Cout, Cin).astype(jnp.float32)
    z = jnp.einsum("nchw,oc->nohw", x_nchw.astype(jnp.float32), w)
    scale = bn_gamma / jnp.sqrt(bn_var + eps)
    z = z * scale[None, :, None, None] + (bn_beta - bn_mean * scale)[None, :, None, None]
    z = jnp.maximum(z, 0.0)
    z = z.reshape(N, Cout, H // 2, 2, W // 2, 2).mean(axis=(3, 5))
    return z


if __name__ == "__main__":
    # small shapes consistent with the module
    N, Cin, H, W = 2, 4, 16, 16
    Cout = 2  # DenseNet transitions typically halve channels

    key = jax.random.PRNGKey(0)
    k_x, k_w, k_g, k_b, k_m, k_v = jax.random.split(key, 6)

    x = jax.random.normal(k_x, (N, Cin, H, W), dtype=jnp.float32)
    conv_w = jax.random.normal(k_w, (Cout, Cin, 1, 1), dtype=jnp.float32) * 0.5
    bn_gamma = jax.random.uniform(k_g, (Cout,), minval=0.5, maxval=1.5)
    bn_beta = jax.random.normal(k_b, (Cout,)) * 0.1
    bn_mean = jax.random.normal(k_m, (Cout,)) * 0.1
    bn_var = jax.random.uniform(k_v, (Cout,), minval=0.5, maxval=1.5)

    ref = _reference(x, conv_w, bn_gamma, bn_beta, bn_mean, bn_var)

    # f32 compute path: proves equivalence with the module semantics (NCHW I/O).
    out_f32 = transition_forward(x, conv_w, bn_gamma, bn_beta, bn_mean, bn_var,
                                 compute_dtype=jnp.float32)
    out_f32 = jax.block_until_ready(out_f32)
    np.testing.assert_allclose(np.asarray(out_f32), np.asarray(ref),
                               rtol=1e-5, atol=1e-5)
    assert out_f32.shape == (N, Cout, H // 2, W // 2)

    # bf16 production path (NCHW parity wrapper; bf16 output, f32 MXU acc).
    out_bf16 = transition_forward(x, conv_w, bn_gamma, bn_beta, bn_mean, bn_var)
    out_bf16 = jax.block_until_ready(out_bf16)
    np.testing.assert_allclose(np.asarray(out_bf16.astype(jnp.float32)),
                               np.asarray(ref), rtol=5e-2, atol=5e-2)

    # Channels-last entry (preferred: no NCHW<->NHWC passes at all).
    x_nhwc = jnp.transpose(x, (0, 2, 3, 1))
    out_nhwc = transition_forward_nhwc(x_nhwc, conv_w, bn_gamma, bn_beta,
                                       bn_mean, bn_var)
    out_nhwc = jax.block_until_ready(out_nhwc)
    np.testing.assert_allclose(
        np.asarray(jnp.transpose(out_nhwc.astype(jnp.float32), (0, 3, 1, 2))),
        np.asarray(ref), rtol=5e-2, atol=5e-2)

    print("KERNEL_OK")
</pallas_src>

<mosaic_0001>
module attributes {stable_mosaic.version = 11 : i64} {
  func.func @kernel(%arg0: i32, %arg1: memref<4x16x128xf32, #tpu.memory_space<vmem>>, %arg2: memref<128x128xf32, #tpu.memory_space<vmem>>, %arg3: memref<1x128xf32, #tpu.memory_space<vmem>>, %arg4: memref<16x128xf32, #tpu.memory_space<vmem>>) attributes {dimension_semantics = [#tpu.dimension_semantics<parallel>], iteration_bounds = array<i64: 8>, scalar_prefetch = 0 : i64, scratch_operands = 0 : i64, tpu.core_type = #tpu.core_type<tc>, window_params = [{transform_indices = @transform_0, window_bounds = array<i64: 4, 16, 128>}, {pipeline_mode = #tpu.pipeline_mode<synchronous>, transform_indices = @transform_1, window_bounds = array<i64: 128, 128>}, {pipeline_mode = #tpu.pipeline_mode<synchronous>, transform_indices = @transform_2, window_bounds = array<i64: 1, 128>}, {transform_indices = @transform_3, window_bounds = array<i64: 16, 128>}]} {
    %c0 = arith.constant 0 : index
    %c0_0 = arith.constant 0 : index
    %0 = vector.load %arg2[%c0, %c0_0] : memref<128x128xf32, #tpu.memory_space<vmem>>, vector<128x128xf32>
    %c0_1 = arith.constant 0 : index
    %c0_2 = arith.constant 0 : index
    %1 = vector.load %arg3[%c0_1, %c0_2] : memref<1x128xf32, #tpu.memory_space<vmem>>, vector<1x128xf32>
    %c0_3 = arith.constant 0 : index
    %c0_4 = arith.constant 0 : index
    %c0_5 = arith.constant 0 : index
    %2 = vector.load %arg1[%c0_3, %c0_4, %c0_5] : memref<4x16x128xf32, #tpu.memory_space<vmem>>, vector<1x16x128xf32>
    %3 = vector.shape_cast %2 : vector<1x16x128xf32> to vector<16x128xf32>
    %cst = arith.constant dense<0.000000e+00> : vector<16x128xf32>
    %4 = tpu.matmul %3, %0, %cst {dimension_numbers = #tpu.dot_dimension_numbers<[1], [0], [0], [1], [0, 0, 1, 1], [], []>} : vector<16x128xf32>, vector<128x128xf32>, vector<16x128xf32> -> vector<16x128xf32>
    %5 = vector.broadcast %1 : vector<1x128xf32> to vector<16x128xf32>
    %6 = arith.addf %4, %5 : vector<16x128xf32>
    %cst_6 = arith.constant 0.000000e+00 : f32
    %7 = vector.broadcast %cst_6 : f32 to vector<16x128xf32>
    %8 = arith.maximumf %6, %7 : vector<16x128xf32>
    %c1 = arith.constant 1 : index
    %c0_7 = arith.constant 0 : index
    %c0_8 = arith.constant 0 : index
    %9 = vector.load %arg1[%c1, %c0_7, %c0_8] : memref<4x16x128xf32, #tpu.memory_space<vmem>>, vector<1x16x128xf32>
    %10 = vector.shape_cast %9 : vector<1x16x128xf32> to vector<16x128xf32>
    %cst_9 = arith.constant dense<0.000000e+00> : vector<16x128xf32>
    %11 = tpu.matmul %10, %0, %cst_9 {dimension_numbers = #tpu.dot_dimension_numbers<[1], [0], [0], [1], [0, 0, 1, 1], [], []>} : vector<16x128xf32>, vector<128x128xf32>, vector<16x128xf32> -> vector<16x128xf32>
    %12 = vector.broadcast %1 : vector<1x128xf32> to vector<16x128xf32>
    %13 = arith.addf %11, %12 : vector<16x128xf32>
    %cst_10 = arith.constant 0.000000e+00 : f32
    %14 = vector.broadcast %cst_10 : f32 to vector<16x128xf32>
    %15 = arith.maximumf %13, %14 : vector<16x128xf32>
    %16 = arith.addf %8, %15 : vector<16x128xf32>
    %c2 = arith.constant 2 : index
    %c0_11 = arith.constant 0 : index
    %c0_12 = arith.constant 0 : index
    %17 = vector.load %arg1[%c2, %c0_11, %c0_12] : memref<4x16x128xf32, #tpu.memory_space<vmem>>, vector<1x16x128xf32>
    %18 = vector.shape_cast %17 : vector<1x16x128xf32> to vector<16x128xf32>
    %cst_13 = arith.constant dense<0.000000e+00> : vector<16x128xf32>
    %19 = tpu.matmul %18, %0, %cst_13 {dimension_numbers = #tpu.dot_dimension_numbers<[1], [0], [0], [1], [0, 0, 1, 1], [], []>} : vector<16x128xf32>, vector<128x128xf32>, vector<16x128xf32> -> vector<16x128xf32>
    %20 = vector.broadcast %1 : vector<1x128xf32> to vector<16x128xf32>
    %21 = arith.addf %19, %20 : vector<16x128xf32>
    %cst_14 = arith.constant 0.000000e+00 : f32
    %22 = vector.broadcast %cst_14 : f32 to vector<16x128xf32>
    %23 = arith.maximumf %21, %22 : vector<16x128xf32>
    %24 = arith.addf %16, %23 : vector<16x128xf32>
    %c3 = arith.constant 3 : index
    %c0_15 = arith.constant 0 : index
    %c0_16 = arith.constant 0 : index
    %25 = vector.load %arg1[%c3, %c0_15, %c0_16] : memref<4x16x128xf32, #tpu.memory_space<vmem>>, vector<1x16x128xf32>
    %26 = vector.shape_cast %25 : vector<1x16x128xf32> to vector<16x128xf32>
    %cst_17 = arith.constant dense<0.000000e+00> : vector<16x128xf32>
    %27 = tpu.matmul %26, %0, %cst_17 {dimension_numbers = #tpu.dot_dimension_numbers<[1], [0], [0], [1], [0, 0, 1, 1], [], []>} : vector<16x128xf32>, vector<128x128xf32>, vector<16x128xf32> -> vector<16x128xf32>
    %28 = vector.broadcast %1 : vector<1x128xf32> to vector<16x128xf32>
    %29 = arith.addf %27, %28 : vector<16x128xf32>
    %cst_18 = arith.constant 0.000000e+00 : f32
    %30 = vector.broadcast %cst_18 : f32 to vector<16x128xf32>
    %31 = arith.maximumf %29, %30 : vector<16x128xf32>
    %32 = arith.addf %24, %31 : vector<16x128xf32>
    %c0_19 = arith.constant 0 : index
    %c0_20 = arith.constant 0 : index
    %33 = vector.load %arg4[%c0_19, %c0_20] : memref<16x128xf32, #tpu.memory_space<vmem>>, vector<16x128xf32>
    tpu.vector_store %arg4[%c0_19, %c0_20], %32 {strides = array<i32>} : memref<16x128xf32, #tpu.memory_space<vmem>>, vector<16x128xf32>,
    return
  }
  func.func @transform_0(%arg0: i32) -> (i32, i32, i32) {
    %c0_i32 = arith.constant 0 : i32
    %c0_i32_0 = arith.constant 0 : i32
    %c0_i32_1 = arith.constant 0 : i32
    return %c0_i32, %arg0, %c0_i32_0 : i32, i32, i32
  }
  func.func @transform_1(%arg0: i32) -> (i32, i32) {
    %c0_i32 = arith.constant 0 : i32
    %c0_i32_0 = arith.constant 0 : i32
    %c0_i32_1 = arith.constant 0 : i32
    return %c0_i32, %c0_i32_0 : i32, i32
  }
  func.func @transform_2(%arg0: i32) -> (i32, i32) {
    %c0_i32 = arith.constant 0 : i32
    %c0_i32_0 = arith.constant 0 : i32
    %c0_i32_1 = arith.constant 0 : i32
    return %c0_i32, %c0_i32_0 : i32, i32
  }
  func.func @transform_3(%arg0: i32) -> (i32, i32) {
    %c0_i32 = arith.constant 0 : i32
    %c0_i32_0 = arith.constant 0 : i32
    return %arg0, %c0_i32 : i32, i32
  }
}

</mosaic_0001>

<bundles_post_ra>
// kernel: tpu_custom_call.1
= control target key start
LH: loop header
LB: loop body
LE: loop exit
PB: predicated region body
PF: predicated region fallthrough
CT: control target
= control target key end

     0   :  { %8 = vsyncpa [#allocation3], 0  ;;  %s1464_s0 = inlined_call_operand.hbm [shape: f32[4,128,128], index: 0, kind: input, shape index: {}]   ;;  %s1465_s1 = inlined_call_operand.hbm [shape: f32[128,128], index: 1, kind: input, shape index: {}]   ;;  %s1466_s2 = inlined_call_operand.vmem [shape: f32[1,128], index: 2, kind: input, shape index: {}]   ;;  %s1467_s3 = inlined_call_operand.hbm [shape: f32[128,128], index: 3, kind: output, shape index: {}]  }
   0x1   :  { %10 = vsyncpa [#allocation3 + $0x1], 0 }
   0x2   :  { %11 = vsyncpa [#allocation6], 0 }
   0x3   :  { %12 = vsyncpa [#allocation4], 0 }
   0x4   :  { %14 = vsyncpa [#allocation4 + $0x1], 0  ;;  %s1246_s12 = smov 0   ;;  %s1248_s13 = smov 0  }
   0x5   :  { %s1250_s14 = smov 0   ;;  %s1252_s15 = smov 0  }
   0x6 LB: > { %s1267_s16 = sadd.s32 4294967295, %s1212_s15   ;;  %s678_s17 = sadd.s32 4294967294, %s1212_s15   ;;  %s1212_s15 = sphi %s1252_s15, %s1489_s15   ;;  %s1208_s14 = sphi %s1250_s14, %s1488_s14   ;;  %s1204_s13 = sphi %s1248_s13, %s1487_s13   ;;  %s1200_s12 = sphi %s1246_s12, %s1486_s12  }
   0x7   : > { %s1271_s18 = sadd.s32 1, %s1212_s15   ;;  %s27_s19 = sadd.s32 1, %s1208_s14 }
   0x8   : > { %s24_s20 = ssub.s32 %s1212_s15, %s1271_s18  ;;  %p34_p0 = scmp.ne.s32.totalorder %s1208_s14, %s1204_s13 }
   0x9   : > { %p25_p1 = scmp.eq.s32.totalorder %s24_s20, 0  ;;  %p35_p2 = scmp.eq.s32.totalorder %s1212_s15, 0 }
   0xa   : > { %p40_p3 = scmp.ne.s32.totalorder %s1204_s13, %s1200_s12  ;;  %p1468_p4 = scmp.eq.s32.totalorder %s1267_s16, 0 }
   0xb   : > { %s1283_s21 = scalar_select %p25_p1, %s1208_s14, %s27_s19  }
   0xc   : > { %p1285_p5 = por %p35_p2, %p34_p0  ;;  %p1291_p6 = por %p1468_p4, %p40_p3 }
   0xd   : > { %p106_p7 = scmp.eq.s32.totalorder %s1267_s16, 7  ;;  %p112_p8 = scmp.eq.s32.totalorder %s678_s17, 7 }
   0xe   : > { %s1473_s22 = scalar_select %p1285_p5, 1, 0 }
   0xf   : > { %s1474_s23 = scalar_select %p1291_p6, 1, 0 }
  0x10   : > { %p679_p9 = scmp.ge.s32.totalorder %s1212_s15, 1  ;;  %p119_p10 = scmp.lt.s32.totalorder %s1212_s15, 9 }
  0x11   : > { %p1298_p11 = por %p106_p7, %p34_p0  ;;  %p1302_p12 = por %p112_p8, %p40_p3 }
  0x12   : > { %p1306_p13 = pnand %p679_p9, %p119_p10  ;;  %s1214_s27 = smov [#allocation5]  }
  0x13   : > { %s1475_s24 = scalar_select %p1298_p11, 1, 0 }
  0x14   : > { %s1476_s25 = scalar_select %p1302_p12, 1, 0 }
  0x15   : > { %s1477_s26 = scalar_select %p1306_p13, 1, 0 }
  0x16   : > { %p1060_p1 = pneg %p1306_p13  ;;  %s131_s28 = sshll.u32 %s1214_s27, 4  ;;  %s132_s28 = int_to_ptr.vmem [resolvable:$true] %s131_s28 }
  0x17   : > { %s1114_s5 = scalar_lea.hbm %s1465_s1, 2048 }
  0x18   : > { %p1314_p2 = pnand %p1060_p1, %p1468_p4  ;;  %p1115_p0 = scmp.ne.s32.totalorder %s1465_s1, %s1114_s5 }
  0x19   : > { %p1121_p9 = scmp.lt.u32.totalorder %s1114_s5, %s1465_s1 }
  0x1a   : > { %p1116_p3 = pneg %p1314_p2 }
  0x1c   : > { %p1117_p7 = pnand %p1116_p3, %p1115_p0 }
  0x1e   : > { %p1118_p8 = pneg %p1117_p7 }
  0x20   : > { %p1123_p10 = pnand %p1121_p9, %p1118_p8 }
  0x22   : > { %1126 = shalt.err (!%p1123_p10)
}
  0x23   : > { %s1127_s10 = scalar_lea.vmem %s132_s28, 2048  ;;  %p1135_p11 = scmp.lt.s32.totalorder %s132_s28, %s132_s28 }
  0x24   : > { %p1128_p1 = scmp.ne.s32.totalorder %s132_s28, %s1127_s10  ;;  %p1136_p6 = scmp.lt.s32.totalorder %s1127_s10, %s1127_s10 }
  0x26   : > { %p1130_p4 = pnand %p1128_p1, %p1116_p3  ;;  %p1137_p13 = por %p1136_p6, %p1135_p11 }
  0x28   : > { %p1131_p12 = pneg %p1130_p4 }
  0x2a   : > { %p1138_p5 = pnand %p1137_p13, %p1131_p12 }
  0x2c   : > { %1141 = shalt.err (!%p1138_p5)
}
  0x2d   : > { %s1215_s11 = smov 128   ;;  %s1216_s17 = smov 8  }
  0x2e   : > { %1063 = dma.hbm_to_vmem [thread:$0]  (!%p1314_p2), %s1465_s1, 2048, %s132_s28, [#allocation6], %s1215_s11, %s1215_s11, %s1216_s17  }
  0x2f   : > { %p681_p0 = scmp.ge.s32.totalorder %s1212_s15, 8 }
  0x31   : > { %144 = sbr.rel (%p681_p0) target bundleno = 71 (0x47), region = 24 }
  0x38   : > { %s148_s27 = sand.u32 1, %s1208_s14   ;;  %s703_s30 = sshll.u32 %s1212_s15, 8 }
  0x39   : > { %s682_s4 = sshll.u32 %s148_s27, 6  ;;  %s158_s6 = scalar_lea.hbm %s1464_s0, %s703_s30 }
  0x3a   : > { %p1479_p4 = scmp.ne.s32.totalorder %s1473_s22, 0  ;;  %s152_s7 = scalar_lea.vmem [#allocation2], %s682_s4 }
  0x3b   : > { %s171_s8 = sshll.u32 %s152_s7, 4  ;;  %s1217_s10 = smov 2048   ;;  %s172_s8 = int_to_ptr.vmem [resolvable:$true] %s171_s8 }
  0x3c   : > { %s1047_s28 = scalar_select %p1479_p4, [#allocation0], [#allocation10] }
  0x3d   : > { %1048 = sst [smem:[#allocation9]] (%p1479_p4), %s1217_s10  ;;  %s1218_s11 = smov 256  }
  0x3e   : > { %s163_s9 = sld [smem:[%s1047_s28]]   ;;  %s1219_s17 = smov 2  }
  0x3f   : > { %1049 = sst [smem:[#allocation9 + $0x1]] (%p1479_p4), %s1218_s11  ;;  %s1220_s19 = smov 128  }
  0x40   : > { %1050 = sst [smem:[#allocation9 + $0x2]] (%p1479_p4), %s1219_s17  ;;  %s1221_s30 = smov 8  }
  0x41   : > { %1051 = sst [smem:[#allocation9 + $0x3]] (%p1479_p4), %s1220_s19  ;;  %s149_s5 = scalar_lea.sflag [#allocation3], %s148_s27 }
  0x42   : > { %1052 = sst [smem:[#allocation9 + $0x4]] (%p1479_p4), %s1220_s19  ;;  %s1222_s29 = smov [#allocation8]  }
  0x43   : > { %1053 = sst [smem:[#allocation9 + $0x5]] (%p1479_p4), %s1221_s30 }
  0x44   : > { %s685_s20 = sshll.u32 %s163_s9, 26 }
  0x45   : > { %s686_s4 = sadd.s32 134217728, %s685_s20 }
  0x46   : > { %1054 = dma.general (%p1479_p4), %s158_s6, 1024, %s172_s8, %s149_s5, %s1222_s29, [#allocation9], %s686_s4, 0  }
  0x47 PF: > { %p1480_p5 = scmp.ne.s32.totalorder %s1477_s26, 0 }
  0x48   : > { %s1359_s28 = sand.u32 (!%p1480_p5), 1, %s1204_s13   ;;  %p1481_p6 = scmp.ne.s32.totalorder (!%p1480_p5), %s1474_s23, 0 }
  0x49   : > { %196 = sbr.rel (%p1480_p5) target bundleno = 387 (0x183), region = 32  ;;  %s688_s7 = sshll.u32 (!%p1480_p5), %s1359_s28, 6 }
  0x4a   : > { %s199_s9 = scalar_lea.sflag (!%p1480_p5), [#allocation3], %s1359_s28  ;;  %s1363_s10 = scalar_lea.vmem (!%p1480_p5), [#allocation2], %s688_s7 }
  0x50   : > { %1187 = dma.done.wait (%p1481_p6), %s199_s9, 1024  }
  0x51   : > { %1189 = vsyncadd (%p1481_p6), %s199_s9, 4294966272  ;;  %p1482_p11 = scmp.eq.s32.totalorder %s1267_s16, 0 }
  0x53   : > { %1191 = dma.done.wait (%p1482_p11), [#allocation6], 2048   ;;  %p1483_p12 = pmov %p1482_p11 }
  0x54   : > { %v231_v0 = vld [vmem:[#allocation5] sm:$0xff]  ;;  %v232_v1 = vld [vmem:[#allocation5 + $0x8] sm:$0xff]  ;;  %v233_v2 = vld [vmem:[#allocation5 + $0x10] sm:$0xff]  ;;  %s690_s26 = sshll.u32 %s1359_s28, 4  ;;  %s704_s8 = sshll.u32 %s1267_s16, 8 }
  0x55   : > { %1193 = vsyncadd (%p1483_p12), [#allocation6], 4294965248  ;;  %v1373_v3 = vpack.c.bf16 %v232_v1, %v231_v0  ;;  %v234_v4 = vld [vmem:[#allocation5 + $0x18] sm:$0xff]  ;;  %v235_v6 = vld [vmem:[#allocation5 + $0x20] sm:$0xff]  ;;  %s228_s27 = scalar_lea.vmem [#allocation7], %s690_s26  ;;  %s1421_s19 = scalar_lea.hbm %s1467_s3, %s704_s8 }
  0x56   : > { %v1375_v5 = vpack.c.bf16 %v234_v4, %v233_v2  ;;  %v236_v7 = vld [vmem:[#allocation5 + $0x28] sm:$0xff]  ;;  %v248_v9 = vld [vmem:[%s1363_s10] sm:$0xff]  ;;  %v692_v10 = vld [vmem:[%s1363_s10 + $0x10] sm:$0xff]  ;;  %s595_s6 = sshll.u32 %s228_s27, 4  ;;  %s582_s20 = scalar_lea.sflag [#allocation4], %s1359_s28  ;;  %s1416_s6 = int_to_ptr.vmem [resolvable:$true] %s595_s6 }
  0x57   : > { %918 = vmatprep.subr.bf16.mxu0 %v1373_v3  ;;  %950 = vmatprep.subr.bf16.mxu1 %v1373_v3  ;;  %v1383_v8 = vpack.c.bf16 %v236_v7, %v235_v6  ;;  %v237_v11 = vld [vmem:[#allocation5 + $0x30] sm:$0xff]  ;;  %v238_v12 = vld [vmem:[#allocation5 + $0x38] sm:$0xff]  ;;  %v239_v14 = vld [vmem:[#allocation5 + $0x40] sm:$0xff]  ;;  %s1142_s30 = scalar_lea.vmem %s1416_s6, 256  ;;  %p1484_p2 = scmp.ne.s32.totalorder %s1475_s24, 0 }
  0x58   : > { %920 = vmatpush3.bf16.msra.mxu0 %v1373_v3  ;;  %952 = vmatpush3.bf16.msra.mxu1 %v1373_v3  ;;  %v929_v13 = vpack.c.bf16 %v238_v12, %v237_v11  ;;  %v240_v15 = vld [vmem:[#allocation5 + $0x48] sm:$0xff]  ;;  %v241_v17 = vld [vmem:[#allocation5 + $0x50] sm:$0xff]  ;;  %v242_v18 = vld [vmem:[#allocation5 + $0x58] sm:$0xff]  ;;  %p1143_p13 = scmp.ne.s32.totalorder %s1416_s6, %s1142_s30  ;;  %s1223_s16 = smov [#allocation7]  }
  0x59   : > { %922 = vmatprep.subr.bf16.mxu0 %v1375_v5  ;;  %954 = vmatprep.subr.bf16.mxu1 %v1375_v5  ;;  %v933_v16 = vpack.c.bf16 %v240_v15, %v239_v14  ;;  %v937_v19 = vpack.c.bf16 %v242_v18, %v241_v17  ;;  %v243_v20 = vld [vmem:[#allocation5 + $0x60] sm:$0xff]  ;;  %v244_v21 = vld [vmem:[#allocation5 + $0x68] sm:$0xff]  ;;  %v245_v23 = vld [vmem:[#allocation5 + $0x70] sm:$0xff]  ;;  %s1146_s4 = sshll.u32 %s1223_s16, 4  ;;  %s1147_s4 = int_to_ptr.vmem [resolvable:$false] %s1146_s4 }
  0x5a   : > { %809 = vmatprep.mubr.f32.mxu0 %v248_v9  ;;  %844 = vmatprep.mubr.f32.mxu1 %v692_v10  ;;  %v941_v22 = vpack.c.bf16 %v244_v21, %v243_v20  ;;  %v246_v24 = vld [vmem:[#allocation5 + $0x78] sm:$0xff]  ;;  %v249_v26 = vld [vmem:[%s1363_s10 + $0x8] sm:$0xff]  ;;  %v694_v28 = vld [vmem:[%s1363_s10 + $0x20] sm:$0xff]  ;;  %p1144_p3 = pnand %p1143_p13, %p1484_p2  ;;  %s1148_s5 = scalar_lea.vmem %s1147_s4, 512 }
  0x5b   : > { %v945_v25 = vpack.c.bf16 %v246_v24, %v245_v23  ;;  %v693_v27 = vld [vmem:[%s1363_s10 + $0x18] sm:$0xff]  ;;  %v696_v29 = vld [vmem:[%s1363_s10 + $0x30] sm:$0xff]  ;;  %v695_v30 = vld [vmem:[%s1363_s10 + $0x28] sm:$0xff]  ;;  %p1149_p8 = scmp.lt.s32.totalorder %s1416_s6, %s1147_s4  ;;  %p1150_p9 = scmp.lt.s32.totalorder %s1148_s5, %s1142_s30 }
  0x5c   : > { %924 = vmatpush3.bf16.msra.mxu0 %v1375_v5  ;;  %956 = vmatpush3.bf16.msra.mxu1 %v1375_v5  ;;  %v697_v31 = vld [vmem:[%s1363_s10 + $0x38] sm:$0xff]  ;;  %v691_v32 = vld [vmem:[%s1466_s2] ss:$0 sm:$0xff]  ;;  %p1145_p7 = pneg %p1144_p3 }
  0x5d   : > { %926 = vmatprep.subr.bf16.mxu0 %v1383_v8  ;;  %958 = vmatprep.subr.bf16.mxu1 %v1383_v8  ;;  %p1151_p10 = por %p1150_p9, %p1149_p8 }
  0x5f   : > { %p1152_p1 = pnand %p1151_p10, %p1145_p7 }
  0x60   : > { %928 = vmatpush3.bf16.msra.mxu0 %v1383_v8  ;;  %960 = vmatpush3.bf16.msra.mxu1 %v1383_v8 }
  0x61   : > { %930 = vmatprep.subr.bf16.mxu0 %v929_v13  ;;  %962 = vmatprep.subr.bf16.mxu1 %v929_v13 }
  0x64   : > { %932 = vmatpush3.bf16.msra.mxu0 %v929_v13  ;;  %964 = vmatpush3.bf16.msra.mxu1 %v929_v13 }
  0x65   : > { %934 = vmatprep.subr.bf16.mxu0 %v933_v16  ;;  %966 = vmatprep.subr.bf16.mxu1 %v933_v16 }
  0x68   : > { %936 = vmatpush3.bf16.msra.mxu0 %v933_v16  ;;  %968 = vmatpush3.bf16.msra.mxu1 %v933_v16 }
  0x69   : > { %938 = vmatprep.subr.bf16.mxu0 %v937_v19  ;;  %970 = vmatprep.subr.bf16.mxu1 %v937_v19 }
  0x6c   : > { %940 = vmatpush3.bf16.msra.mxu0 %v937_v19  ;;  %972 = vmatpush3.bf16.msra.mxu1 %v937_v19 }
  0x6d   : > { %942 = vmatprep.subr.bf16.mxu0 %v941_v22  ;;  %974 = vmatprep.subr.bf16.mxu1 %v941_v22 }
  0x70   : > { %944 = vmatpush3.bf16.msra.mxu0 %v941_v22  ;;  %976 = vmatpush3.bf16.msra.mxu1 %v941_v22 }
  0x71   : > { %946 = vmatprep.subr.bf16.mxu0 %v945_v25  ;;  %978 = vmatprep.subr.bf16.mxu1 %v945_v25 }
  0x74   : > { %948 = vmatpush3.bf16.msra.mxu0 %v945_v25  ;;  %980 = vmatpush3.bf16.msra.mxu1 %v945_v25 }
  0x75   : > { %982 = vmatprep.subr.bf16.mxu0 %v1373_v3  ;;  %1014 = vmatprep.subr.bf16.mxu1 %v1373_v3 }
  0x77   : > { %810 = vmatmul.mubr.f32.vlgmr.msra.gmra.mrb[0].mxu0 %v249_v26  ;;  %845 = vmatmul.mubr.f32.vlgmr.msra.gmra.mrb[0].mxu1 %v693_v27 }
  0x78   : > { %984 = vmatpush3.bf16.msra.mxu0 %v1373_v3  ;;  %1016 = vmatpush3.bf16.msra.mxu1 %v1373_v3 }
  0x79   : > { %986 = vmatprep.subr.bf16.mxu0 %v1375_v5  ;;  %1018 = vmatprep.subr.bf16.mxu1 %v1375_v5 }
  0x7a   : > { %879 = vmatprep.mubr.f32.mxu0 %v694_v28  ;;  %914 = vmatprep.mubr.f32.mxu1 %v696_v29 }
  0x7c   : > { %988 = vmatpush3.bf16.msra.mxu0 %v1375_v5  ;;  %1020 = vmatpush3.bf16.msra.mxu1 %v1375_v5 }
  0x7d   : > { %990 = vmatprep.subr.bf16.mxu0 %v1383_v8  ;;  %1022 = vmatprep.subr.bf16.mxu1 %v1383_v8 }
  0x80   : > { %992 = vmatpush3.bf16.msra.mxu0 %v1383_v8  ;;  %1024 = vmatpush3.bf16.msra.mxu1 %v1383_v8 }
  0x81   : > { %994 = vmatprep.subr.bf16.mxu0 %v929_v13  ;;  %1026 = vmatprep.subr.bf16.mxu1 %v929_v13 }
  0x84   : > { %996 = vmatpush3.bf16.msra.mxu0 %v929_v13  ;;  %1028 = vmatpush3.bf16.msra.mxu1 %v929_v13 }
  0x85   : > { %998 = vmatprep.subr.bf16.mxu0 %v933_v16  ;;  %1030 = vmatprep.subr.bf16.mxu1 %v933_v16 }
  0x88   : > { %1000 = vmatpush3.bf16.msra.mxu0 %v933_v16  ;;  %1032 = vmatpush3.bf16.msra.mxu1 %v933_v16 }
  0x89   : > { %1002 = vmatprep.subr.bf16.mxu0 %v937_v19  ;;  %1034 = vmatprep.subr.bf16.mxu1 %v937_v19 }
  0x8c   : > { %1004 = vmatpush3.bf16.msra.mxu0 %v937_v19  ;;  %1036 = vmatpush3.bf16.msra.mxu1 %v937_v19 }
  0x8d   : > { %1006 = vmatprep.subr.bf16.mxu0 %v941_v22  ;;  %1038 = vmatprep.subr.bf16.mxu1 %v941_v22 }
  0x90   : > { %1008 = vmatpush3.bf16.msra.mxu0 %v941_v22  ;;  %1040 = vmatpush3.bf16.msra.mxu1 %v941_v22 }
  0x91   : > { %1010 = vmatprep.subr.bf16.mxu0 %v945_v25  ;;  %1042 = vmatprep.subr.bf16.mxu1 %v945_v25 }
  0x94   : > { %1012 = vmatpush3.bf16.msra.mxu0 %v945_v25  ;;  %1044 = vmatpush3.bf16.msra.mxu1 %v945_v25 }
  0x97   : > { %880 = vmatmul.mubr.f32.vlgmr.msra.gmra.mrb[2].mxu0 %v695_v30  ;;  %915 = vmatmul.mubr.f32.vlgmr.msra.gmra.mrb[2].mxu1 %v697_v31 }
 0x14a   : > { %v811_v33 = vpop.f32.mrb[0].mxu0  ;;  %v846_v34 = vpop.f32.mrb[0].mxu1 }
 0x14b   : > { %v328_v35 = vadd.f32 %v811_v33, %v691_v32  ;;  %v408_v36 = vadd.f32 %v846_v34, %v691_v32  ;;  %v322_v37 = vpop.f32.mrb[1].mxu0  ;;  %v402_v38 = vpop.f32.mrb[1].mxu1 }
 0x14c   : > { %v323_v39 = vadd.f32 %v691_v32, %v322_v37  ;;  %v403_v40 = vadd.f32 %v691_v32, %v402_v38 }
 0x14d   : > { %v332_v41 = vmax.f32 %v328_v35, 0.0  ;;  %v412_v42 = vmax.f32 %v408_v36, 0.0 }
 0x14e   : > { %v331_v43 = vmax.f32 %v323_v39, 0.0  ;;  %v411_v44 = vmax.f32 %v403_v40, 0.0 }
 0x14f   : > { %v414_v45 = vadd.f32 %v412_v42, %v332_v41 }
 0x150   : > { %v413_v46 = vadd.f32 %v411_v44, %v331_v43 }
 0x16a   : > { %v881_v47 = vpop.f32.mrb[2].mxu0  ;;  %v916_v48 = vpop.f32.mrb[2].mxu1 }
 0x16b   : > { %v490_v49 = vadd.f32 %v881_v47, %v691_v32  ;;  %v484_v50 = vpop.f32.mrb[3].mxu0  ;;  %v572_v51 = vadd.f32 %v916_v48, %v691_v32  ;;  %v566_v52 = vpop.f32.mrb[3].mxu1 }
 0x16c   : > { %v485_v53 = vadd.f32 %v691_v32, %v484_v50  ;;  %v567_v54 = vadd.f32 %v691_v32, %v566_v52 }
 0x16d   : > { %v494_v55 = vmax.f32 %v490_v49, 0.0  ;;  %v576_v56 = vmax.f32 %v572_v51, 0.0 }
 0x16e   : > { %v493_v57 = vmax.f32 %v485_v53, 0.0  ;;  %v575_v58 = vmax.f32 %v567_v54, 0.0 }
 0x16f   : > { %v496_v59 = vadd.f32 %v494_v55, %v414_v45 }
 0x170   : > { %v495_v60 = vadd.f32 %v493_v57, %v413_v46 }
 0x171   : > { %v578_v61 = vadd.f32 %v576_v56, %v496_v59 }
 0x172   : > { %v577_v62 = vadd.f32 %v575_v58, %v495_v60 }
 0x173   : > { %580 = vst [vmem:[%s228_s27 + $0x8] sm:$0xff] %v578_v61 }
 0x174   : > { %579 = vst [vmem:[%s228_s27] sm:$0xff] %v577_v62 }
 0x175   : > { %1155 = shalt.err (!%p1152_p1)
}
 0x176   : > { %s1156_s29 = scalar_lea.hbm %s1421_s19, 256  ;;  %s1160_s10 = scalar_lea.hbm %s1467_s3, 2048 }
 0x177   : > { %p1157_p0 = scmp.ne.s32.totalorder %s1421_s19, %s1156_s29  ;;  %p1161_p6 = scmp.lt.u32.totalorder %s1421_s19, %s1467_s3 }
 0x178   : > { %p1162_p11 = scmp.lt.u32.totalorder %s1160_s10, %s1156_s29  ;;  %p1164_p13 = scmp.lt.u32.totalorder %s1156_s29, %s1421_s19 }
 0x179   : > { %p1158_p4 = pnand %p1157_p0, %p1484_p2 }
 0x17a   : > { %p1163_p12 = por %p1162_p11, %p1161_p6 }
 0x17b   : > { %p1159_p5 = pneg %p1158_p4 }
 0x17c   : > { %p1165_p3 = por %p1164_p13, %p1163_p12 }
 0x17e   : > { %p1166_p7 = pnand %p1165_p3, %p1159_p5 }
 0x180   : > { %1169 = shalt.err (!%p1166_p7)
}
 0x181   : > { %s1224_s26 = smov 128   ;;  %s1225_s27 = smov 8  }
 0x182   : > { %1058 = dma.vmem_to_hbm [thread:$0]  (%p1484_p2), %s1416_s6, 256, %s1421_s19, %s582_s20, %s1224_s26, %s1224_s26, %s1225_s27  }
 0x183 PF: > { %p1070_p8 = scmp.ge.s32.totalorder %s1212_s15, 2  ;;  %s610_s8 = sand.u32 1, %s1200_s12  }
 0x184   : > { %p1485_p9 = scmp.ne.s32.totalorder %s1476_s25, 0  ;;  %s611_s11 = scalar_lea.sflag [#allocation4], %s610_s8 }
 0x186   : > { %p1065_p10 = pnand %p1070_p8, %p1485_p9 }
 0x188   : > { %1195 = dma.done.wait (!%p1065_p10), %s611_s11, 256  }
 0x189   : > { %1197 = vsyncadd (!%p1065_p10), %s611_s11, 4294967040  ;;  %p17_p1 = scmp.ge.s32.totalorder %s1271_s18, 10   ;;  %s1486_s12 = smov %s1204_s13 }
 0x18a   : > { %s1487_s13 = smov %s1208_s14  ;;  %s1488_s14 = smov %s1283_s21 }
 0x18b   : > { %s1489_s15 = smov %s1271_s18  ;;  %19 = sbr.rel (!%p17_p1) target bundleno = 6 (0x6), region = 89 }
 0x192   :  { %616 = vsyncpa [#allocation3], 1 }
 0x193   :  { %618 = vsyncpa [#allocation3 + $0x1], 1 }
 0x194   :  { %619 = vsyncpa [#allocation6], 1 }
 0x195   :  { %620 = vsyncpa [#allocation4], 1 }
 0x196   :  { %622 = vsyncpa [#allocation4 + $0x1], 1 }

</bundles_post_ra>
